<compile_context>
chip_gen: v5e
topology: v5e:2x2
jax: 0.10.0
libtpu: 0.0.40
codegen_flags: <defaults>
</compile_context>

<pallas_src>
import numpy as np
import jax
import jax.numpy as jnp
from jax.experimental import pallas as pl
from jax.experimental.pallas import tpu as pltpu

MAX_LENGTH = 15            # sentences per document
MAX_SENTENCE_LENGTH = 192  # tokens per sentence
FILTER_WIDTHS = (2, 3, 4)
K_MAX = max(FILTER_WIDTHS)           # widest conv filter (4)
NUM_WIN = 16                         # im2col windows per doc (>= 14, sublane-aligned)
N_SCORES = 12
NEG = -1e30                          # "-inf" for masking invalid windows


# ---------------------------------------------------------------------------
# Pallas kernel: fused im2col conv1/2/3 -> mask -> max-pool over time ->
# bias + ReLU -> ONE fused output matmul over [feats | scores], TB docs / step.
# ---------------------------------------------------------------------------
def cnn_head_kernel(win_ref, s_ref, wp_ref, bias_ref, mask_ref, wo_ref, bo_ref,
                    out_ref):
    tb, nw, kh = win_ref.shape
    c3 = wp_ref.shape[1]              # 3 * out_channels

    # single fused conv matmul: (TB*NW, K_MAX*H) @ (K_MAX*H, 3C), f32 accumulation
    win = win_ref[...].reshape(tb * nw, kh)
    conv = jnp.dot(win, wp_ref[...], preferred_element_type=jnp.float32)
    conv = conv.reshape(tb, nw, c3) + mask_ref[...]      # mask invalid windows (-inf)
    feats = jnp.max(conv, axis=1)                        # time max-pool -> (TB, 3C)
    feats = jnp.maximum(feats + bias_ref[...], 0.0)      # bias + ReLU after the pool

    # one fused output matmul (f32 operands: tiny K, keeps scores full precision)
    cat = jnp.concatenate([feats, s_ref[...]], axis=-1)  # (TB, 3C + 12)
    out_ref[...] = (jnp.dot(cat, wo_ref[...], preferred_element_type=jnp.float32)
                    + bo_ref[...])                       # lane-dense (TB, n_pad) store


def cnn_head(embeds, scores, params, *, n_classes, tb=None,
             matmul_dtype=jnp.bfloat16):
    """embeds: (B, L, H) f32; scores: (B, 12) f32 -> logits (B, n_classes) f32."""
    B, L, H = embeds.shape
    assert L == MAX_LENGTH
    # mask-before-pool / bias-after-pool identity needs >=1 valid window per filter
    for k in FILTER_WIDTHS:
        assert MAX_LENGTH - k + 1 >= 1
    assert NUM_WIN >= MAX_LENGTH - min(FILTER_WIDTHS) + 1

    w1, b1, w2, b2, w3, b3, wo, bo = params
    C = w1.shape[2]
    C3 = 3 * C
    KH = K_MAX * H
    itemsize = np.dtype(matmul_dtype).itemsize

    # ---- batch-block size: large M per step, >=2 grid steps when B allows
    #      (v7x has 2 TensorCores), capped by a VMEM budget for the windows block
    if tb is None:
        b8 = ((B + 7) // 8) * 8
        tb = min(128, max(8, (b8 // 2) // 8 * 8))
    row_bytes = NUM_WIN * KH * itemsize          # one doc's windows
    vmem_cap = (8 * 1024 * 1024 // (2 * row_bytes)) // 8 * 8   # ~8 MiB double-buffered
    tb = max(8, min(tb, max(vmem_cap, 8)))
    assert tb % 8 == 0
    b_pad = ((B + tb - 1) // tb) * tb

    # ---- one-time packing on the wrapper side (nothing sliced in-kernel) ----
    def pad_k(w):                                     # (k, H, C) -> (K_MAX*H, C)
        return jnp.pad(w, ((0, K_MAX - w.shape[0]), (0, 0), (0, 0))).reshape(KH, C)

    w_packed = jnp.concatenate(
        [pad_k(w1), pad_k(w2), pad_k(w3)], axis=1).astype(matmul_dtype)  # (K_MAX*H, 3C)
    bias_cat = jnp.concatenate([b1, b2, b3], axis=1).astype(jnp.float32)  # (1, 3C)

    # additive mask: window t is valid for filter group g (k = 2 + g) iff t <= L - k
    t_idx = jnp.arange(NUM_WIN, dtype=jnp.int32)[:, None]
    g_idx = jnp.arange(C3, dtype=jnp.int32)[None, :] // C
    mask = jnp.where(t_idx <= (MAX_LENGTH - 2 - g_idx), 0.0, NEG).astype(jnp.float32)

    # fused output weight [wo_feat ; wo_scores] in f32, padded to 128-lane slab
    n_pad = ((n_classes + 127) // 128) * 128
    wo_cat = jnp.zeros((C3 + N_SCORES, n_pad), jnp.float32).at[:, :n_classes].set(
        wo.astype(jnp.float32))
    bo_pad = jnp.zeros((1, n_pad), jnp.float32).at[:, :n_classes].set(
        bo.astype(jnp.float32))

    # ---- wrapper-side im2col: lane-dense (b_pad, NUM_WIN, K_MAX*H) windows ----
    e = embeds.astype(matmul_dtype)
    e = jnp.pad(e, ((0, b_pad - B), (0, NUM_WIN + K_MAX - 1 - L), (0, 0)))
    windows = jnp.concatenate(
        [e[:, dk:dk + NUM_WIN, :] for dk in range(K_MAX)], axis=-1)  # (b_pad, NW, KH)
    # handcrafted scores stay f32 (precision; they feed the f32 output matmul)
    s_p = jnp.zeros((b_pad, N_SCORES), jnp.float32).at[:B].set(
        scores.astype(jnp.float32))

    full = lambda a: pl.BlockSpec(a.shape, lambda b: (0,) * a.ndim)
    grid_spec = pltpu.PrefetchScalarGridSpec(
        num_scalar_prefetch=0,
        grid=(b_pad // tb,),
        in_specs=[
            pl.BlockSpec((tb, NUM_WIN, KH), lambda b: (b, 0, 0)),  # im2col windows
            pl.BlockSpec((tb, N_SCORES), lambda b: (b, 0)),        # scores (f32)
            full(w_packed), full(bias_cat), full(mask),
            full(wo_cat), full(bo_pad),
        ],
        out_specs=pl.BlockSpec((tb, n_pad), lambda b: (b, 0)),
    )

    flops = (2 * b_pad * NUM_WIN * KH * C3                  # fused conv matmul
             + 2 * b_pad * (C3 + N_SCORES) * n_pad)         # fused output matmul
    bytes_accessed = (windows.size * itemsize + s_p.size * 4
                      + w_packed.size * itemsize + bias_cat.size * 4 + mask.size * 4
                      + wo_cat.size * 4 + bo_pad.size * 4
                      + b_pad * n_pad * 4)

    out = pl.pallas_call(
        cnn_head_kernel,
        out_shape=jax.ShapeDtypeStruct((b_pad, n_pad), jnp.float32),
        grid_spec=grid_spec,
        compiler_params=pltpu.CompilerParams(
            dimension_semantics=("parallel",)),   # batch blocks split across TCs (v7x)
        cost_estimate=pl.CostEstimate(flops=flops, transcendentals=0,
                                      bytes_accessed=bytes_accessed),
    )(windows, s_p, w_packed, bias_cat, mask, wo_cat, bo_pad)
    return out[:B, :n_classes]


# ---------------------------------------------------------------------------
# Plain-JAX glue: deterministic stand-in for BERT pooler + reference check.
# ---------------------------------------------------------------------------
def fake_bert_pooler(input_ids, attention_mask, emb_table, w_pool, b_pool, hidden):
    # input_ids/attention_mask: (B, MAX_LENGTH, MAX_SENTENCE_LENGTH)
    ids = input_ids.reshape((-1, MAX_SENTENCE_LENGTH))
    mask = attention_mask.reshape((-1, MAX_SENTENCE_LENGTH)).astype(jnp.float32)
    tok = emb_table[ids]                                        # (BS, T, H)
    mean = (tok * mask[..., None]).sum(1) / jnp.maximum(mask.sum(1, keepdims=True), 1.0)
    pooled = jnp.tanh(mean @ w_pool + b_pool)                   # (BS, H)
    return pooled.reshape((-1, MAX_LENGTH, hidden))             # (B, L, H)


def reference_head(embeds, scores, params):
    w1, b1, w2, b2, w3, b3, wo, bo = params
    B, L, H = embeds.shape

    def conv_pool(w, b):
        k = w.shape[0]
        lout = L - k + 1
        win = jnp.stack([embeds[:, dk:dk + lout, :] for dk in range(k)], axis=2)
        out = jnp.einsum("blkh,khc->blc", win, w) + b[None]     # (B, lout, C)
        return jnp.max(jnp.maximum(out, 0.0), axis=1)           # (B, C)

    feats = jnp.concatenate(
        [conv_pool(w1, b1), conv_pool(w2, b2), conv_pool(w3, b3), scores], axis=1)
    return feats @ wo + bo


if __name__ == "__main__":
    # Small, deterministic config.
    hidden = 32
    out_channels = 8
    n_classes = 4
    vocab = 50

    key = jax.random.PRNGKey(0)
    ks = jax.random.split(key, 12)

    # --- synthetic "BERT" stand-in parameters (plain JAX glue) ---
    emb_table = 0.02 * jax.random.normal(ks[0], (vocab, hidden), jnp.float32)
    w_pool = 0.02 * jax.random.normal(ks[1], (hidden, hidden), jnp.float32)
    b_pool = 0.02 * jax.random.normal(ks[2], (hidden,), jnp.float32)

    # --- CNN head parameters (deterministic) ---
    def conv_params(k, kw, kb):
        w = 0.05 * jax.random.normal(kw, (k, hidden, out_channels), jnp.float32)
        b = 0.05 * jax.random.normal(kb, (1, out_channels), jnp.float32)
        return w, b

    w1, b1 = conv_params(FILTER_WIDTHS[0], ks[3], ks[4])
    w2, b2 = conv_params(FILTER_WIDTHS[1], ks[5], ks[6])
    w3, b3 = conv_params(FILTER_WIDTHS[2], ks[7], ks[8])
    wo = 0.05 * jax.random.normal(ks[9], (3 * out_channels + N_SCORES, n_classes),
                                  jnp.float32)
    bo = 0.05 * jax.random.normal(ks[10], (1, n_classes), jnp.float32)
    params = (w1, b1, w2, b2, w3, b3, wo, bo)

    def run_case(batch, seed_key):
        kin = jax.random.split(seed_key, 3)
        input_ids = jax.random.randint(
            kin[0], (batch, MAX_LENGTH, MAX_SENTENCE_LENGTH), 0, vocab, jnp.int32)
        attention_mask = (jax.random.uniform(
            kin[1], (batch, MAX_LENGTH, MAX_SENTENCE_LENGTH)) > 0.2).astype(jnp.int32)
        attention_mask = attention_mask.at[..., 0].set(1)  # non-empty sentences
        scores = jax.random.normal(kin[2], (batch, N_SCORES), jnp.float32)

        embeds = fake_bert_pooler(input_ids, attention_mask, emb_table, w_pool,
                                  b_pool, hidden)              # (B, L, H)
        ref = reference_head(embeds, scores, params)

        # f32 MXU operands (tight check).
        logits = jax.block_until_ready(
            cnn_head(embeds, scores, params, n_classes=n_classes,
                     matmul_dtype=jnp.float32))
        assert logits.shape == (batch, n_classes)
        assert jnp.allclose(logits, ref, atol=1e-4, rtol=1e-4), (batch, logits, ref)

        # bf16 MXU operands (default); accumulation + VPU math + scores stay f32.
        logits_bf16 = jax.block_until_ready(
            cnn_head(embeds, scores, params, n_classes=n_classes))
        assert jnp.allclose(logits_bf16, ref, atol=2e-2, rtol=2e-2), (
            batch, logits_bf16, ref)

    run_case(2, ks[11])                   # single grid step, B < tb
    run_case(19, jax.random.PRNGKey(1))   # B not a multiple of 8 -> padded, multi-step grid

    print("KERNEL_OK")
</pallas_src>

<mosaic_0001>
module attributes {stable_mosaic.version = 11 : i64} {
  func.func @cnn_head_kernel(%arg0: i32, %arg1: memref<8x16x128xf32, #tpu.memory_space<vmem>>, %arg2: memref<8x12xf32, #tpu.memory_space<vmem>>, %arg3: memref<128x24xf32, #tpu.memory_space<vmem>>, %arg4: memref<1x24xf32, #tpu.memory_space<vmem>>, %arg5: memref<16x24xf32, #tpu.memory_space<vmem>>, %arg6: memref<36x128xf32, #tpu.memory_space<vmem>>, %arg7: memref<1x128xf32, #tpu.memory_space<vmem>>, %arg8: memref<8x128xf32, #tpu.memory_space<vmem>>) attributes {dimension_semantics = [#tpu.dimension_semantics<parallel>], iteration_bounds = array<i64: 1>, scalar_prefetch = 0 : i64, scratch_operands = 0 : i64, tpu.core_type = #tpu.core_type<tc>, window_params = [{transform_indices = @transform_0, window_bounds = array<i64: 8, 16, 128>}, {transform_indices = @transform_1, window_bounds = array<i64: 8, 12>}, {pipeline_mode = #tpu.pipeline_mode<synchronous>, transform_indices = @transform_2, window_bounds = array<i64: 128, 24>}, {pipeline_mode = #tpu.pipeline_mode<synchronous>, transform_indices = @transform_3, window_bounds = array<i64: 1, 24>}, {pipeline_mode = #tpu.pipeline_mode<synchronous>, transform_indices = @transform_4, window_bounds = array<i64: 16, 24>}, {pipeline_mode = #tpu.pipeline_mode<synchronous>, transform_indices = @transform_5, window_bounds = array<i64: 36, 128>}, {pipeline_mode = #tpu.pipeline_mode<synchronous>, transform_indices = @transform_6, window_bounds = array<i64: 1, 128>}, {transform_indices = @transform_7, window_bounds = array<i64: 8, 128>}]} {
    %c0 = arith.constant 0 : index
    %c0_0 = arith.constant 0 : index
    %c0_1 = arith.constant 0 : index
    %0 = vector.load %arg1[%c0, %c0_0, %c0_1] : memref<8x16x128xf32, #tpu.memory_space<vmem>>, vector<8x16x128xf32>
    %1 = vector.shape_cast %0 : vector<8x16x128xf32> to vector<128x128xf32>
    %c0_2 = arith.constant 0 : index
    %c0_3 = arith.constant 0 : index
    %2 = vector.load %arg3[%c0_2, %c0_3] : memref<128x24xf32, #tpu.memory_space<vmem>>, vector<128x24xf32>
    %cst = arith.constant dense<0.000000e+00> : vector<128x24xf32>
    %3 = tpu.matmul %1, %2, %cst {dimension_numbers = #tpu.dot_dimension_numbers<[1], [0], [0], [1], [0, 0, 1, 1], [], []>} : vector<128x128xf32>, vector<128x24xf32>, vector<128x24xf32> -> vector<128x24xf32>
    %4 = vector.shape_cast %3 : vector<128x24xf32> to vector<8x16x24xf32>
    %c0_4 = arith.constant 0 : index
    %c0_5 = arith.constant 0 : index
    %5 = vector.load %arg5[%c0_4, %c0_5] : memref<16x24xf32, #tpu.memory_space<vmem>>, vector<16x24xf32>
    %6 = vector.shape_cast %5 : vector<16x24xf32> to vector<1x16x24xf32>
    %7 = vector.broadcast %6 : vector<1x16x24xf32> to vector<8x16x24xf32>
    %8 = arith.addf %4, %7 : vector<8x16x24xf32>
    %cst_6 = arith.constant dense<0xFF800000> : vector<8x24xf32>
    %9 = vector.multi_reduction <maximumf>, %8, %cst_6 [1] : vector<8x16x24xf32> to vector<8x24xf32>
    %c0_7 = arith.constant 0 : index
    %c0_8 = arith.constant 0 : index
    %10 = vector.load %arg4[%c0_7, %c0_8] : memref<1x24xf32, #tpu.memory_space<vmem>>, vector<1x24xf32>
    %11 = vector.broadcast %10 : vector<1x24xf32> to vector<8x24xf32>
    %12 = arith.addf %9, %11 : vector<8x24xf32>
    %cst_9 = arith.constant 0.000000e+00 : f32
    %13 = vector.broadcast %cst_9 : f32 to vector<8x24xf32>
    %14 = arith.maximumf %12, %13 : vector<8x24xf32>
    %c0_10 = arith.constant 0 : index
    %c0_11 = arith.constant 0 : index
    %15 = vector.load %arg2[%c0_10, %c0_11] : memref<8x12xf32, #tpu.memory_space<vmem>>, vector<8x12xf32>
    %16 = tpu.concatenate %14, %15 in 1 : vector<8x24xf32>, vector<8x12xf32> -> vector<8x36xf32>
    %c0_12 = arith.constant 0 : index
    %c0_13 = arith.constant 0 : index
    %17 = vector.load %arg6[%c0_12, %c0_13] : memref<36x128xf32, #tpu.memory_space<vmem>>, vector<36x128xf32>
    %cst_14 = arith.constant dense<0.000000e+00> : vector<8x128xf32>
    %18 = tpu.matmul %16, %17, %cst_14 {dimension_numbers = #tpu.dot_dimension_numbers<[1], [0], [0], [1], [0, 0, 1, 1], [], []>} : vector<8x36xf32>, vector<36x128xf32>, vector<8x128xf32> -> vector<8x128xf32>
    %c0_15 = arith.constant 0 : index
    %c0_16 = arith.constant 0 : index
    %19 = vector.load %arg7[%c0_15, %c0_16] : memref<1x128xf32, #tpu.memory_space<vmem>>, vector<1x128xf32>
    %20 = vector.broadcast %19 : vector<1x128xf32> to vector<8x128xf32>
    %21 = arith.addf %18, %20 : vector<8x128xf32>
    %c0_17 = arith.constant 0 : index
    %c0_18 = arith.constant 0 : index
    %22 = vector.load %arg8[%c0_17, %c0_18] : memref<8x128xf32, #tpu.memory_space<vmem>>, vector<8x128xf32>
    tpu.vector_store %arg8[%c0_17, %c0_18], %21 {strides = array<i32>} : memref<8x128xf32, #tpu.memory_space<vmem>>, vector<8x128xf32>,
    return
  }
  func.func @transform_0(%arg0: i32) -> (i32, i32, i32) {
    %c0_i32 = arith.constant 0 : i32
    %c0_i32_0 = arith.constant 0 : i32
    %c0_i32_1 = arith.constant 0 : i32
    return %arg0, %c0_i32, %c0_i32_0 : i32, i32, i32
  }
  func.func @transform_1(%arg0: i32) -> (i32, i32) {
    %c0_i32 = arith.constant 0 : i32
    %c0_i32_0 = arith.constant 0 : i32
    return %arg0, %c0_i32 : i32, i32
  }
  func.func @transform_2(%arg0: i32) -> (i32, i32) {
    %c0_i32 = arith.constant 0 : i32
    %c0_i32_0 = arith.constant 0 : i32
    %c0_i32_1 = arith.constant 0 : i32
    return %c0_i32, %c0_i32_0 : i32, i32
  }
  func.func @transform_3(%arg0: i32) -> (i32, i32) {
    %c0_i32 = arith.constant 0 : i32
    %c0_i32_0 = arith.constant 0 : i32
    %c0_i32_1 = arith.constant 0 : i32
    return %c0_i32, %c0_i32_0 : i32, i32
  }
  func.func @transform_4(%arg0: i32) -> (i32, i32) {
    %c0_i32 = arith.constant 0 : i32
    %c0_i32_0 = arith.constant 0 : i32
    %c0_i32_1 = arith.constant 0 : i32
    return %c0_i32, %c0_i32_0 : i32, i32
  }
  func.func @transform_5(%arg0: i32) -> (i32, i32) {
    %c0_i32 = arith.constant 0 : i32
    %c0_i32_0 = arith.constant 0 : i32
    %c0_i32_1 = arith.constant 0 : i32
    return %c0_i32, %c0_i32_0 : i32, i32
  }
  func.func @transform_6(%arg0: i32) -> (i32, i32) {
    %c0_i32 = arith.constant 0 : i32
    %c0_i32_0 = arith.constant 0 : i32
    %c0_i32_1 = arith.constant 0 : i32
    return %c0_i32, %c0_i32_0 : i32, i32
  }
  func.func @transform_7(%arg0: i32) -> (i32, i32) {
    %c0_i32 = arith.constant 0 : i32
    %c0_i32_0 = arith.constant 0 : i32
    return %arg0, %c0_i32 : i32, i32
  }
}

</mosaic_0001>

<bundles_post_ra>
// kernel: tpu_custom_call.1
= control target key start
LH: loop header
LB: loop body
LE: loop exit
PB: predicated region body
PF: predicated region fallthrough
CT: control target
= control target key end

     0   :  { %12 = vsyncpa [#allocation3], 0  ;;  %s650_s0 = inlined_call_operand.vmem [shape: f32[8,16,128], index: 0, kind: input, shape index: {}]   ;;  %s651_s1 = inlined_call_operand.vmem [shape: f32[8,12], index: 1, kind: input, shape index: {}]   ;;  %s652_s2 = inlined_call_operand.vmem [shape: f32[128,24], index: 2, kind: input, shape index: {}]   ;;  %s653_s3 = inlined_call_operand.vmem [shape: f32[1,24], index: 3, kind: input, shape index: {}]   ;;  %s654_s4 = inlined_call_operand.vmem [shape: f32[16,24], index: 4, kind: input, shape index: {}]   ;;  %s655_s5 = inlined_call_operand.hbm [shape: f32[36,128], index: 5, kind: input, shape index: {}]   ;;  %s656_s6 = inlined_call_operand.vmem [shape: f32[1,128], index: 6, kind: input, shape index: {}]   ;;  %s657_s7 = inlined_call_operand.hbm [shape: f32[8,128], index: 7, kind: output, shape index: {}]  }
   0x1   :  { %13 = vsyncpa [#allocation4], 0  ;;  %s28_s26 = sshll.u32 %s655_s5, 4  ;;  %s451_s27 = smov [#allocation2]   ;;  %s29_s26 = int_to_ptr.hbm [resolvable:$true] %s28_s26 }
   0x2   :  { %s30_s28 = sshll.u32 %s451_s27, 4  ;;  %s452_s29 = smov 128   ;;  %s31_s28 = int_to_ptr.vmem [resolvable:$true] %s30_s28 }
   0x3   :  { %s453_s30 = smov 8  }
   0x4   :  { %36 = dma.hbm_to_vmem [thread:$0]  %s29_s26, 640, %s31_s28, [#allocation3], %s452_s29, %s452_s29, %s453_s30  }
   0x5   :  { %447 = dma.done.wait [#allocation3], 640  }
   0x6   :  { %448 = vsyncadd [#allocation3], 4294966656  ;;  %v74_v0 = vld [vmem:[%s652_s2 + $0x78] sm:$0xff]  ;;  %v73_v1 = vld [vmem:[%s652_s2 + $0x70] sm:$0xff]  ;;  %s454_s24 = smov 24   ;;  %vm158_vm0 = vcmask 195584  }
   0x7   :  { %75 = vmatpush.msra.mxu0 %v74_v0  ;;  %344 = vmatpush.msra.mxu1 %v74_v0  ;;  %v72_v2 = vld [vmem:[%s652_s2 + $0x68] sm:$0xff]  ;;  %v71_v3 = vld [vmem:[%s652_s2 + $0x60] sm:$0xff]  ;;  %v70_v4 = vld [vmem:[%s652_s2 + $0x58] sm:$0xff]  ;;  %vm300_vm1 = vcmask 1043456   ;;  %vm261_vm2 = vcmask 1041409   ;;  %vm264_vm3 = vcmask 1042434  }
   0x8   :  { %345 = vmatpush.msra.mxu2 %v74_v0  ;;  %346 = vmatpush.msra.mxu3 %v74_v0  ;;  %v69_v5 = vld [vmem:[%s652_s2 + $0x50] sm:$0xff]  ;;  %v68_v6 = vld [vmem:[%s652_s2 + $0x48] sm:$0xff]  ;;  %v67_v7 = vld [vmem:[%s652_s2 + $0x40] sm:$0xff]  ;;  %vm267_vm4 = vcmask 1043459   ;;  %vm270_vm5 = vcmask 1044484   ;;  %vm273_vm6 = vcmask 1045509  }
   0x9   :  { %76 = vmatpush.msra.mxu0 %v73_v1  ;;  %347 = vmatpush.msra.mxu1 %v73_v1  ;;  %v66_v8 = vld [vmem:[%s652_s2 + $0x38] sm:$0xff]  ;;  %v65_v9 = vld [vmem:[%s652_s2 + $0x30] sm:$0xff]  ;;  %v64_v10 = vld [vmem:[%s652_s2 + $0x28] sm:$0xff]  ;;  %vm276_vm7 = vcmask 1046534   ;;  %vm279_vm8 = vcmask 1047559   ;;  %vm296_vm9 = vcmask 293888  }
   0xa   :  { %348 = vmatpush.msra.mxu2 %v73_v1  ;;  %349 = vmatpush.msra.mxu3 %v73_v1  ;;  %v63_v11 = vld [vmem:[%s652_s2 + $0x20] sm:$0xff]  ;;  %v62_v12 = vld [vmem:[%s652_s2 + $0x18] sm:$0xff]  ;;  %v61_v13 = vld [vmem:[%s652_s2 + $0x10] sm:$0xff]  ;;  %s455_s28 = smov [#allocation5]   ;;  %s332_s9 = sshll.u32 %s657_s7, 4  ;;  %s333_s9 = int_to_ptr.hbm [resolvable:$true] %s332_s9 }
   0xb   :  { %77 = vmatpush.msra.mxu0 %v72_v2  ;;  %350 = vmatpush.msra.mxu1 %v72_v2  ;;  %v60_v14 = vld [vmem:[%s652_s2 + $0x8] sm:$0xff]  ;;  %v59_v15 = vld [vmem:[%s652_s2] sm:$0xff]  ;;  %v46_v17 = vld [vmem:[%s650_s0 + $0x18] sm:$0xff]  ;;  %s330_s29 = sshll.u32 %s455_s28, 4  ;;  %s331_s29 = int_to_ptr.vmem [resolvable:$true] %s330_s29 }
   0xc   :  { %351 = vmatpush.msra.mxu2 %v72_v2  ;;  %352 = vmatpush.msra.mxu3 %v72_v2  ;;  %v43_v16 = vld [vmem:[%s650_s0] sm:$0xff]  ;;  %v50_v18 = vld [vmem:[%s650_s0 + $0x38] sm:$0xff]  ;;  %v44_v21 = vld [vmem:[%s650_s0 + $0x8] sm:$0xff] }
   0xd   :  { %78 = vmatpush.msra.mxu0 %v71_v3  ;;  %353 = vmatpush.msra.mxu1 %v71_v3  ;;  %v54_v19 = vld [vmem:[%s650_s0 + $0x58] sm:$0xff]  ;;  %v251_v20 = vld [vmem:[%s651_s1] sm:$0xff]  ;;  %v45_v25 = vld [vmem:[%s650_s0 + $0x10] sm:$0xff] }
   0xe   :  { %354 = vmatpush.msra.mxu2 %v71_v3  ;;  %355 = vmatpush.msra.mxu3 %v71_v3  ;;  %v47_v22 = vld [vmem:[%s650_s0 + $0x20] sm:$0xff]  ;;  %v48_v26 = vld [vmem:[%s650_s0 + $0x28] sm:$0xff]  ;;  %v49_v29 = vld [vmem:[%s650_s0 + $0x30] sm:$0xff] }
   0xf   :  { %79 = vmatpush.msra.mxu0 %v70_v4  ;;  %356 = vmatpush.msra.mxu1 %v70_v4  ;;  %v51_v23 = vld [vmem:[%s650_s0 + $0x40] sm:$0xff]  ;;  %v52_v27 = vld [vmem:[%s650_s0 + $0x48] sm:$0xff]  ;;  %v53_v30 = vld [vmem:[%s650_s0 + $0x50] sm:$0xff] }
  0x10   :  { %357 = vmatpush.msra.mxu2 %v70_v4  ;;  %358 = vmatpush.msra.mxu3 %v70_v4  ;;  %v55_v24 = vld [vmem:[%s650_s0 + $0x60] sm:$0xff]  ;;  %v56_v28 = vld [vmem:[%s650_s0 + $0x68] sm:$0xff]  ;;  %v57_v31 = vld [vmem:[%s650_s0 + $0x70] sm:$0xff] }
  0x11   :  { %80 = vmatpush.msra.mxu0 %v69_v5  ;;  %359 = vmatpush.msra.mxu1 %v69_v5  ;;  %v58_v32 = vld [vmem:[%s650_s0 + $0x78] sm:$0xff]  ;;  %v601_v35 = vld [vmem:[%s654_s4] sm:$0xff]  ;;  %v606_v40 = vld [vmem:[%s654_s4 + $0x8] sm:$0xff] }
  0x12   :  { %360 = vmatpush.msra.mxu2 %v69_v5  ;;  %361 = vmatpush.msra.mxu3 %v69_v5  ;;  %v291_v3 = vld [vmem:[#allocation2 + $0x20] sm:$0xf]  ;;  %v290_v4 = vld [vmem:[#allocation2 + $0x18] sm:$0xff] }
  0x13   :  { %81 = vmatpush.msra.mxu0 %v68_v6  ;;  %362 = vmatpush.msra.mxu1 %v68_v6 }
  0x14   :  { %363 = vmatpush.msra.mxu2 %v68_v6  ;;  %364 = vmatpush.msra.mxu3 %v68_v6 }
  0x15   :  { %82 = vmatpush.msra.mxu0 %v67_v7  ;;  %365 = vmatpush.msra.mxu1 %v67_v7 }
  0x16   :  { %366 = vmatpush.msra.mxu2 %v67_v7  ;;  %367 = vmatpush.msra.mxu3 %v67_v7 }
  0x17   :  { %83 = vmatpush.msra.mxu0 %v66_v8  ;;  %368 = vmatpush.msra.mxu1 %v66_v8 }
  0x18   :  { %369 = vmatpush.msra.mxu2 %v66_v8  ;;  %370 = vmatpush.msra.mxu3 %v66_v8 }
  0x19   :  { %84 = vmatpush.msra.mxu0 %v65_v9  ;;  %371 = vmatpush.msra.mxu1 %v65_v9 }
  0x1a   :  { %372 = vmatpush.msra.mxu2 %v65_v9  ;;  %373 = vmatpush.msra.mxu3 %v65_v9 }
  0x1b   :  { %85 = vmatpush.msra.mxu0 %v64_v10  ;;  %374 = vmatpush.msra.mxu1 %v64_v10 }
  0x1c   :  { %375 = vmatpush.msra.mxu2 %v64_v10  ;;  %376 = vmatpush.msra.mxu3 %v64_v10 }
  0x1d   :  { %86 = vmatpush.msra.mxu0 %v63_v11  ;;  %377 = vmatpush.msra.mxu1 %v63_v11 }
  0x1e   :  { %378 = vmatpush.msra.mxu2 %v63_v11  ;;  %379 = vmatpush.msra.mxu3 %v63_v11 }
  0x1f   :  { %87 = vmatpush.msra.mxu0 %v62_v12  ;;  %380 = vmatpush.msra.mxu1 %v62_v12 }
  0x20   :  { %381 = vmatpush.msra.mxu2 %v62_v12  ;;  %382 = vmatpush.msra.mxu3 %v62_v12 }
  0x21   :  { %88 = vmatpush.msra.mxu0 %v61_v13  ;;  %383 = vmatpush.msra.mxu1 %v61_v13 }
  0x22   :  { %384 = vmatpush.msra.mxu2 %v61_v13  ;;  %385 = vmatpush.msra.mxu3 %v61_v13  ;;  %v289_v13 = vld [vmem:[#allocation2 + $0x10] sm:$0xff] }
  0x23   :  { %89 = vmatpush.msra.mxu0 %v60_v14  ;;  %386 = vmatpush.msra.mxu1 %v60_v14 }
  0x24   :  { %387 = vmatpush.msra.mxu2 %v60_v14  ;;  %388 = vmatpush.msra.mxu3 %v60_v14 }
  0x25   :  { %90 = vmatpush.msra.mxu0 %v59_v15  ;;  %389 = vmatpush.msra.mxu1 %v59_v15 }
  0x26   :  { %390 = vmatpush.msra.mxu2 %v59_v15  ;;  %391 = vmatpush.msra.mxu3 %v59_v15 }
  0x27   :  { %91 = vmatmul.f32.vlgmr.msra.gmra.mxu0 %v43_v16  ;;  %100 = vmatmul.f32.vlgmr.msra.gmra.mxu1 %v46_v17 }
  0x28   :  { %112 = vmatmul.f32.vlgmr.msra.gmra.mxu2 %v50_v18  ;;  %124 = vmatmul.f32.vlgmr.msra.gmra.mxu3 %v54_v19 }
  0x29   :  { %283 = vrot.lane.b32.xlu0 %v251_v20, %s454_s24  ;;  %342 = vmatpush.msk.msrb.mxu0 %vm300_vm1, %v291_v3 }
  0x2b   :  { %316 = vmatpush.msrb.mxu0 %v290_v4 }
  0x2d   :  { %317 = vmatpush.msrb.mxu0 %v289_v13 }
  0x2f   :  { %94 = vmatmul.f32.gmra.mxu0 %v44_v21  ;;  %103 = vmatmul.f32.gmra.mxu1 %v47_v22  ;;  %v288_v22 = vld [vmem:[#allocation2 + $0x8] sm:$0xff] }
  0x30   :  { %115 = vmatmul.f32.gmra.mxu2 %v51_v23  ;;  %127 = vmatmul.f32.gmra.mxu3 %v55_v24 }
  0x31   :  { %318 = vmatpush.msrb.mxu0 %v288_v22 }
  0x37   :  { %97 = vmatmul.f32.gmra.mxu0 %v45_v25  ;;  %106 = vmatmul.f32.gmra.mxu1 %v48_v26 }
  0x38   :  { %118 = vmatmul.f32.gmra.mxu2 %v52_v27  ;;  %130 = vmatmul.f32.gmra.mxu3 %v56_v28 }
  0x3f   :  { %109 = vmatmul.f32.gmra.mxu1 %v49_v29  ;;  %v287_v29 = vld [vmem:[#allocation2] sm:$0xff] }
  0x40   :  { %121 = vmatmul.f32.gmra.mxu2 %v53_v30  ;;  %133 = vmatmul.f32.gmra.mxu3 %v57_v31 }
  0x41   :  { %319 = vmatpush.msrb.mxu0 %v287_v29 }
  0x48   :  { %136 = vmatmul.f32.gmra.mxu3 %v58_v32 }
  0xa4   :  { %v92_v33 = vpop.f32.mrf.mxu0  ;;  %v101_v34 = vpop.f32.mrf.mxu1 }
  0xa5   :  { %v142_v41 = vadd.f32 %v601_v35, %v92_v33  ;;  %v145_v46 = vadd.f32 %v606_v40, %v101_v34 }
  0xa7   :  { %v159_v44 = vsel %vm158_vm0, %v142_v41, -inf  ;;  %v169_v55 = vsel %vm158_vm0, %v145_v46, -inf }
  0xab   :  { %v113_v36 = vpop.f32.mrf.mxu2  ;;  %v125_v37 = vpop.f32.mrf.mxu3 }
  0xac   :  { %v95_v38 = vpop.f32.mrf.mxu0  ;;  %v104_v39 = vpop.f32.mrf.mxu1  ;;  %v149_v5 = vadd.f32 %v606_v40, %v113_v36  ;;  %v153_v30 = vadd.f32 %v606_v40, %v125_v37 }
  0xad   :  { %v143_v42 = vadd.f32 %v606_v40, %v95_v38  ;;  %v146_v43 = vadd.f32 %v601_v35, %v104_v39 }
  0xae   :  { %v187_v23 = vsel %vm158_vm0, %v149_v5, -inf  ;;  %v205_v46 = vsel %vm158_vm0, %v153_v30, -inf }
  0xaf   :  { %v160_v45 = vsel %vm158_vm0, %v143_v42, -inf  ;;  %v177_v52 = vsel %vm158_vm0, %v146_v43, -inf }
  0xb0   :  { %v161_v51 = vmax.f32 %v159_v44, %v160_v45 }
  0xb2   :  { %v162_v60 = vrot.slane %v161_v51, 4 }
  0xb3   :  { %v116_v47 = vpop.f32.mrf.mxu2  ;;  %v128_v48 = vpop.f32.mrf.mxu3 }
  0xb4   :  { %v98_v49 = vpop.f32.mrf.mxu0  ;;  %v107_v50 = vpop.f32.mrf.mxu1  ;;  %v150_v61 = vadd.f32 %v601_v35, %v116_v47  ;;  %v154_v0 = vadd.f32 %v601_v35, %v128_v48  ;;  %v163_v10 = vmax.f32 %v161_v51, %v162_v60 }
  0xb5   :  { %v144_v53 = vadd.f32 %v601_v35, %v98_v49  ;;  %v147_v54 = vadd.f32 %v606_v40, %v107_v50 }
  0xb6   :  { %v195_v14 = vsel %vm158_vm0, %v150_v61, -inf  ;;  %v213_v18 = vsel %vm158_vm0, %v154_v0, -inf  ;;  %v164_v26 = vrot.slane %v163_v10, 2 }
  0xb7   :  { %v168_v56 = vsel %vm158_vm0, %v144_v53, -inf  ;;  %v178_v57 = vsel %vm158_vm0, %v147_v54, -inf  ;;  %v397_v54 = vld [vmem:[%s653_s3] ss:$0 sm:$0xff] }
  0xb8   :  { %v170_v58 = vmax.f32 %v168_v56, %v169_v55  ;;  %v179_v59 = vmax.f32 %v177_v52, %v178_v57  ;;  %v165_v43 = vmax.f32 %v163_v10, %v164_v26 }
  0xba   :  { %v171_v62 = vrot.slane %v170_v58, 4  ;;  %v180_v63 = vrot.slane %v179_v59, 4  ;;  %v166_v53 = vrot.slane %v165_v43, 1 }
  0xbb   :  { %v119_v1 = vpop.f32.mrf.mxu2  ;;  %v131_v2 = vpop.f32.mrf.mxu3 }
  0xbc   :  { %v172_v6 = vmax.f32 %v170_v58, %v171_v62  ;;  %v181_v7 = vmax.f32 %v179_v59, %v180_v63  ;;  %v151_v8 = vadd.f32 %v606_v40, %v119_v1  ;;  %v110_v9 = vpop.f32.mrf.mxu1  ;;  %v155_v11 = vadd.f32 %v606_v40, %v131_v2 }
  0xbd   :  { %v148_v12 = vadd.f32 %v601_v35, %v110_v9  ;;  %v167_v2 = vmax.f32 %v165_v43, %v166_v53 }
  0xbe   :  { %v173_v15 = vrot.slane %v172_v6, 2  ;;  %v182_v16 = vrot.slane %v181_v7, 2  ;;  %v196_v17 = vsel %vm158_vm0, %v151_v8, -inf  ;;  %v214_v20 = vsel %vm158_vm0, %v155_v11, -inf }
  0xbf   :  { %v197_v19 = vmax.f32 %v195_v14, %v196_v17  ;;  %v186_v21 = vsel %vm158_vm0, %v148_v12, -inf  ;;  %v215_v25 = vmax.f32 %v213_v18, %v214_v20  ;;  %v235_v13 = vadd.f32 %v397_v54, %v167_v2 }
  0xc0   :  { %v174_v24 = vmax.f32 %v172_v6, %v173_v15  ;;  %v188_v28 = vmax.f32 %v186_v21, %v187_v23  ;;  %v183_v31 = vmax.f32 %v181_v7, %v182_v16 }
  0xc1   :  { %v198_v27 = vrot.slane %v197_v19, 4  ;;  %v216_v32 = vrot.slane %v215_v25, 4  ;;  %v243_v22 = vmax.f32 %v235_v13, 0.0 }
  0xc2   :  { %v175_v33 = vrot.slane %v174_v24, 1  ;;  %v189_v36 = vrot.slane %v188_v28, 4  ;;  %v184_v47 = vrot.slane %v183_v31, 1 }
  0xc3   :  { %v199_v34 = vmax.f32 %v197_v19, %v198_v27  ;;  %v122_v38 = vpop.f32.mrf.mxu2  ;;  %v134_v39 = vpop.f32.mrf.mxu3  ;;  %v217_v41 = vmax.f32 %v215_v25, %v216_v32 }
  0xc4   :  { %v152_v42 = vadd.f32 %v601_v35, %v122_v38  ;;  %v190_v45 = vmax.f32 %v188_v28, %v189_v36  ;;  %v176_v48 = vmax.f32 %v174_v24, %v175_v33  ;;  %v185_v57 = vmax.f32 %v183_v31, %v184_v47 }
  0xc5   :  { %v200_v44 = vrot.slane %v199_v34, 2  ;;  %v218_v52 = vrot.slane %v217_v41, 2  ;;  %v156_v58 = vadd.f32 %v601_v35, %v134_v39 }
  0xc6   :  { %v204_v37 = vsel %vm158_vm0, %v152_v42, -inf  ;;  %v191_v49 = vrot.slane %v190_v45, 2  ;;  %v236_v59 = vadd.f32 %v397_v54, %v176_v48  ;;  %v237_v5 = vadd.f32 %v397_v54, %v185_v57 }
  0xc7   :  { %v206_v50 = vmax.f32 %v204_v37, %v205_v46  ;;  %v201_v51 = vmax.f32 %v199_v34, %v200_v44  ;;  %v219_v0 = vmax.f32 %v217_v41, %v218_v52  ;;  %v222_v6 = vsel %vm158_vm0, %v156_v58, -inf  ;;  %v284_v37 = vpop.permute.xlu0 %283 }
  0xc8   :  { %v192_v55 = vmax.f32 %v190_v45, %v191_v49  ;;  %v244_v8 = vmax.f32 %v236_v59, 0.0  ;;  %v245_v16 = vmax.f32 %v237_v5, 0.0 }
  0xc9   :  { %v207_v56 = vrot.slane %v206_v50, 4  ;;  %v202_v63 = vrot.slane %v201_v51, 1  ;;  %v220_v12 = vrot.slane %v219_v0, 1 }
  0xca   :  { %v193_v60 = vrot.slane %v192_v55, 1  ;;  %v260_v17 = vrot.slane %v244_v8, 7  ;;  %v263_v25 = vrot.slane %v245_v16, 6 }
  0xcb   :  { %v208_v61 = vmax.f32 %v206_v50, %v207_v56  ;;  %v137_v62 = vpop.f32.mrf.mxu3  ;;  %v203_v11 = vmax.f32 %v201_v51, %v202_v63  ;;  %v221_v21 = vmax.f32 %v219_v0, %v220_v12  ;;  %v398_v51 = vld [vmem:[%s656_s6] ss:$0 sm:$0xff] }
  0xcc   :  { %v157_v1 = vadd.f32 %v606_v40, %v137_v62  ;;  %v194_v3 = vmax.f32 %v192_v55, %v193_v60  ;;  %v262_v26 = vsel %vm261_vm2, %v260_v17, %v243_v22 }
  0xcd   :  { %v209_v4 = vrot.slane %v208_v61, 2  ;;  %v239_v20 = vadd.f32 %v397_v54, %v203_v11  ;;  %v241_v31 = vadd.f32 %v397_v54, %v221_v21  ;;  %v265_v33 = vsel %vm264_vm3, %v263_v25, %v262_v26 }
  0xce   :  { %v223_v7 = vsel %vm158_vm0, %v157_v1, -inf  ;;  %v238_v9 = vadd.f32 %v397_v54, %v194_v3 }
  0xcf   :  { %v210_v10 = vmax.f32 %v208_v61, %v209_v4  ;;  %v224_v35 = vmax.f32 %v222_v6, %v223_v7  ;;  %v247_v30 = vmax.f32 %v239_v20, 0.0  ;;  %v249_v41 = vmax.f32 %v241_v31, 0.0 }
  0xd0   :  { %v246_v40 = vmax.f32 %v238_v9, 0.0 }
  0xd1   :  { %v211_v14 = vrot.slane %v210_v10, 1  ;;  %v225_v15 = vrot.slane %v224_v35, 4  ;;  %v269_v39 = vrot.slane %v247_v30, 4  ;;  %v275_v46 = vrot.slane %v249_v41, 2 }
  0xd2   :  { %v266_v27 = vrot.slane %v246_v40, 5 }
  0xd3   :  { %v212_v18 = vmax.f32 %v210_v10, %v211_v14  ;;  %v226_v19 = vmax.f32 %v224_v35, %v225_v15 }
  0xd4   :  { %v268_v38 = vsel %vm267_vm4, %v266_v27, %v265_v33 }
  0xd5   :  { %v240_v23 = vadd.f32 %v397_v54, %v212_v18  ;;  %v227_v24 = vrot.slane %v226_v19, 2  ;;  %v271_v43 = vsel %vm270_vm5, %v269_v39, %v268_v38 }
  0xd7   :  { %v248_v28 = vmax.f32 %v240_v23, 0.0  ;;  %v228_v29 = vmax.f32 %v226_v19, %v227_v24 }
  0xd9   :  { %v229_v32 = vrot.slane %v228_v29, 1  ;;  %v272_v34 = vrot.slane %v248_v28, 3 }
  0xdb   :  { %v230_v36 = vmax.f32 %v228_v29, %v229_v32  ;;  %v274_v45 = vsel %vm273_vm6, %v272_v34, %v271_v43 }
  0xdc   :  { %v277_v48 = vsel %vm276_vm7, %v275_v46, %v274_v45 }
  0xdd   :  { %v242_v42 = vadd.f32 %v397_v54, %v230_v36 }
  0xdf   :  { %v250_v44 = vmax.f32 %v242_v42, 0.0 }
  0xe1   :  { %v278_v47 = vrot.slane %v250_v44, 1 }
  0xe3   :  { %v280_v49 = vsel %vm279_vm8, %v278_v47, %v277_v48 }
  0xe4   :  { %v286_v50 = vsel %vm158_vm0, %v280_v49, %v284_v37 }
  0xe5   :  { %343 = vmatmul.msk.f32.vlgmr.msrb.gmra.mxu0 %vm296_vm9, %v286_v50 }
 0x162   :  { %v321_v52 = vpop.f32.mrf.mxu0 }
 0x163   :  { %v322_v53 = vadd.f32 %v398_v51, %v321_v52 }
 0x165   :  { %324 = vst [vmem:[#allocation5] sm:$0xff] %v322_v53 }
 0x166   :  { %335 = dma.vmem_to_hbm [thread:$0]  %s331_s29, 128, %s333_s9, [#allocation4]  }
 0x167   :  { %449 = dma.done.wait [#allocation4], 128  }
 0x168   :  { %450 = vsyncadd [#allocation4], 4294967168 }
 0x169   :  { %340 = vsyncpa [#allocation3], 1 }
 0x16a   :  { %341 = vsyncpa [#allocation4], 1 }

</bundles_post_ra>
